<compile_context>
chip_gen: v7x
topology: tpu7x:2x2x1
jax: 0.10.0
libtpu: 0.0.40
codegen_flags: <defaults>
</compile_context>

<pallas_src>
import functools

import jax
import jax.numpy as jnp
from jax.experimental import pallas as pl
from jax.experimental.pallas import tpu as pltpu

NEG_SLOPE = 0.01   # F.leaky_relu default negative_slope
BN_EPS = 1e-5      # nn.BatchNorm1d default eps
LANE = 128


def _leaky_relu(x):
    return jnp.where(x >= 0, x, NEG_SLOPE * x)


def _round_up(n, m):
    return ((n + m - 1) // m) * m


def _pad2(a, rows, cols, value=0.0):
    r, c = a.shape
    return jnp.pad(a, ((0, rows - r), (0, cols - c)), constant_values=value)


# ----------------------------------------------------------------------------- params


def init_params(key, input_dim, hidden_dim, output_dim):
    """Synthetic, PyTorch-style init matching the module's shapes.
    Weights are stored (in_features, out_features); biases/BN params as (1, features)."""
    ks = jax.random.split(key, 8)

    def lin(kw, kb, d_in, d_out):
        scale = 1.0 / jnp.sqrt(jnp.float32(d_in))
        w = jax.random.uniform(kw, (d_in, d_out), jnp.float32, -scale, scale)
        b = jax.random.uniform(kb, (1, d_out), jnp.float32, -scale, scale)
        return w, b

    w_fe, b_fe = lin(ks[0], ks[1], input_dim, 32)      # synthetic feature extractor
    w1, b1 = lin(ks[2], ks[3], 32, hidden_dim)         # Classifier.fc1: Linear(32, hidden)
    gamma = jnp.ones((1, hidden_dim), jnp.float32)     # BatchNorm1d weight
    beta = jnp.zeros((1, hidden_dim), jnp.float32)     # BatchNorm1d bias
    w3, b3 = lin(ks[4], ks[5], hidden_dim, 64)         # Classifier.fc3: Linear(hidden, 64)
    w2, b2 = lin(ks[6], ks[7], 64, output_dim)         # Classifier.fc2: Linear(64, output)

    return dict(w_fe=w_fe, b_fe=b_fe, w1=w1, b1=b1, gamma=gamma, beta=beta,
                w3=w3, b3=b3, w2=w2, b2=b2)


def _prepare_padded(params, compute_dtype):
    """Zero-pad all lane dims to multiples of 128 (gamma padded with 1) so every
    intermediate / output is lane-dense. Matmul weights optionally cast to
    compute_dtype; biases and BN params stay float32."""
    d_in, feat = params["w_fe"].shape                  # feat == 32
    hidden = params["w1"].shape[1]
    mid = params["w3"].shape[1]                        # 64
    out = params["w2"].shape[1]

    fp = _round_up(feat, LANE)
    hp = _round_up(hidden, LANE)
    mp = _round_up(mid, LANE)
    op = _round_up(out, LANE)

    pp = dict(
        w_fe=_pad2(params["w_fe"], d_in, fp).astype(compute_dtype),
        b_fe=_pad2(params["b_fe"], 1, fp),
        w1=_pad2(params["w1"], fp, hp).astype(compute_dtype),
        b1=_pad2(params["b1"], 1, hp),
        gamma=_pad2(params["gamma"], 1, hp, value=1.0),
        beta=_pad2(params["beta"], 1, hp),
        w3=_pad2(params["w3"], hp, mp).astype(compute_dtype),
        b3=_pad2(params["b3"], 1, mp),
        w2=_pad2(params["w2"], mp, op).astype(compute_dtype),
        b2=_pad2(params["b2"], 1, op),
    )
    dims = dict(d_in=d_in, feat=feat, fp=fp, hidden=hidden, hp=hp,
                mid=mid, mp=mp, out=out, op=op)
    return pp, dims


# -------------------------------------------------------------- small-batch fused path


def _fused_kernel(x_ref, wfe_ref, bfe_ref, w1_ref, b1_ref, gamma_ref, beta_ref,
                  w3_ref, b3_ref, w2_ref, b2_ref, logits_ref, feat_ref, *, batch):
    cdt = wfe_ref.dtype

    # synthetic feature extractor: Linear + leaky_relu
    f = jnp.dot(x_ref[...].astype(cdt), wfe_ref[...],
                preferred_element_type=jnp.float32) + bfe_ref[...]
    f = _leaky_relu(f)
    feat_ref[...] = f.astype(feat_ref.dtype)

    # classifier.fc1 + leaky_relu
    h = jnp.dot(f.astype(cdt), w1_ref[...],
                preferred_element_type=jnp.float32) + b1_ref[...]
    h = _leaky_relu(h)

    # classifier.bn1 (training mode, biased variance), one-pass sum / sumsq stats
    inv_n = 1.0 / float(batch)
    s1 = jnp.sum(h, axis=0, keepdims=True)
    s2 = jnp.sum(h * h, axis=0, keepdims=True)
    mean = s1 * inv_n
    var = jnp.maximum(s2 * inv_n - mean * mean, 0.0)
    h = (h - mean) * jax.lax.rsqrt(var + BN_EPS) * gamma_ref[...] + beta_ref[...]

    # classifier.fc3 + leaky_relu
    h = jnp.dot(h.astype(cdt), w3_ref[...],
                preferred_element_type=jnp.float32) + b3_ref[...]
    h = _leaky_relu(h)

    # classifier.fc2
    out = jnp.dot(h.astype(cdt), w2_ref[...],
                  preferred_element_type=jnp.float32) + b2_ref[...]
    logits_ref[...] = out.astype(logits_ref.dtype)


def _forward_fused(x, params, compute_dtype):
    pp, dims = _prepare_padded(params, compute_dtype)
    B = x.shape[0]
    args = (x.astype(compute_dtype), pp["w_fe"], pp["b_fe"], pp["w1"], pp["b1"],
            pp["gamma"], pp["beta"], pp["w3"], pp["b3"], pp["w2"], pp["b2"])

    # Tiny problem: no grid / no BlockSpec machinery -> minimal launch overhead,
    # everything whole-array resident in VMEM. Outputs are lane-dense padded slabs.
    logits_p, feat_p = pl.pallas_call(
        functools.partial(_fused_kernel, batch=B),
        out_shape=(jax.ShapeDtypeStruct((B, dims["op"]), jnp.float32),
                   jax.ShapeDtypeStruct((B, dims["fp"]), jnp.float32)),
    )(*args)

    return logits_p[:, :dims["out"]], feat_p[:, :dims["feat"]]


# ------------------------------------------------------------- large-batch tiled path


def _stage1_kernel(x_ref, wfe_ref, bfe_ref, w1_ref, b1_ref,
                   feat_ref, stats_ref, *, batch, tile):
    """Per batch tile: features, fc1 activations, and BN partial sums (sum, sumsq)."""
    cdt = wfe_ref.dtype

    f = jnp.dot(x_ref[...].astype(cdt), wfe_ref[...],
                preferred_element_type=jnp.float32) + bfe_ref[...]
    f = _leaky_relu(f)
    feat_ref[...] = f.astype(feat_ref.dtype)

    h = jnp.dot(f.astype(cdt), w1_ref[...],
                preferred_element_type=jnp.float32) + b1_ref[...]
    h = _leaky_relu(h)

    hp = h.shape[-1]
    # Mask padded batch rows out of the BatchNorm statistics.
    row = jax.lax.broadcasted_iota(jnp.int32, (tile, hp), 0) + pl.program_id(0) * tile
    h_valid = jnp.where(row < batch, h, 0.0)
    s1 = jnp.sum(h_valid, axis=0, keepdims=True)             # (1, hp)
    s2 = jnp.sum(h_valid * h_valid, axis=0, keepdims=True)   # (1, hp)

    # Pack [sum; sumsq; zeros] into this tile's (8, hp) stats block with one store.
    slot = jax.lax.broadcasted_iota(jnp.int32, (8, hp), 0)
    stats_ref[0] = jnp.where(slot == 0, s1, jnp.where(slot == 1, s2, 0.0))


def _stage2_kernel(feat_ref, stats_ref, gamma_ref, beta_ref,
                   w1_ref, b1_ref, w3_ref, b3_ref, w2_ref, b2_ref,
                   logits_ref, *, batch):
    """Per batch tile: recompute fc1 activations from features, normalize with the
    global (full-batch) BN statistics, then fc3 / fc2."""
    cdt = w1_ref.dtype

    h = jnp.dot(feat_ref[...].astype(cdt), w1_ref[...],
                preferred_element_type=jnp.float32) + b1_ref[...]
    h = _leaky_relu(h)

    # Reduce per-tile partials (tiny, resident) -> full-batch mean / variance.
    tot = jnp.sum(stats_ref[...], axis=0)                    # (8, hp)
    inv_n = 1.0 / float(batch)
    mean = tot[0:1, :] * inv_n
    var = jnp.maximum(tot[1:2, :] * inv_n - mean * mean, 0.0)
    h = (h - mean) * jax.lax.rsqrt(var + BN_EPS) * gamma_ref[...] + beta_ref[...]

    h = jnp.dot(h.astype(cdt), w3_ref[...],
                preferred_element_type=jnp.float32) + b3_ref[...]
    h = _leaky_relu(h)

    out = jnp.dot(h.astype(cdt), w2_ref[...],
                  preferred_element_type=jnp.float32) + b2_ref[...]
    logits_ref[...] = out.astype(logits_ref.dtype)


def _forward_tiled(x, params, batch_tile, compute_dtype):
    pp, dims = _prepare_padded(params, compute_dtype)
    B, d_in = x.shape

    tb = _round_up(max(8, min(batch_tile, _round_up(B, 8))), 8)
    b_pad = _round_up(B, tb)
    nt = b_pad // tb
    if b_pad != B:
        x = jnp.pad(x, ((0, b_pad - B), (0, 0)))
    x = x.astype(compute_dtype)

    fp, hp, mp, op = dims["fp"], dims["hp"], dims["mp"], dims["op"]

    def resident(shape):   # weights / small params stay resident across the grid
        return pl.BlockSpec(shape, lambda i, _s=shape: (0,) * len(_s))

    cparams = pltpu.CompilerParams(
        dimension_semantics=("parallel",),            # v7x: shard batch tiles over TCs
        vmem_limit_bytes=48 * 1024 * 1024,            # explicit headroom (v7x 64 MiB phys)
    )

    # Stage 1: features + BN partial statistics, streamed over batch tiles.
    feat_p, stats = pl.pallas_call(
        functools.partial(_stage1_kernel, batch=B, tile=tb),
        grid=(nt,),
        in_specs=[
            pl.BlockSpec((tb, d_in), lambda i: (i, 0)),
            resident((d_in, fp)), resident((1, fp)),
            resident((fp, hp)), resident((1, hp)),
        ],
        out_specs=(
            pl.BlockSpec((tb, fp), lambda i: (i, 0)),
            pl.BlockSpec((1, 8, hp), lambda i: (i, 0, 0)),
        ),
        out_shape=(
            jax.ShapeDtypeStruct((b_pad, fp), jnp.float32),
            jax.ShapeDtypeStruct((nt, 8, hp), jnp.float32),
        ),
        compiler_params=cparams,
    )(x, pp["w_fe"], pp["b_fe"], pp["w1"], pp["b1"])

    # Stage 2: normalize with full-batch stats, fc3 + fc2, streamed over batch tiles.
    logits_p = pl.pallas_call(
        functools.partial(_stage2_kernel, batch=B),
        grid=(nt,),
        in_specs=[
            pl.BlockSpec((tb, fp), lambda i: (i, 0)),
            resident((nt, 8, hp)),
            resident((1, hp)), resident((1, hp)),
            resident((fp, hp)), resident((1, hp)),
            resident((hp, mp)), resident((1, mp)),
            resident((mp, op)), resident((1, op)),
        ],
        out_specs=pl.BlockSpec((tb, op), lambda i: (i, 0)),
        out_shape=jax.ShapeDtypeStruct((b_pad, op), jnp.float32),
        compiler_params=cparams,
    )(feat_p, stats, pp["gamma"], pp["beta"], pp["w1"], pp["b1"],
      pp["w3"], pp["b3"], pp["w2"], pp["b2"])

    return logits_p[:B, :dims["out"]], feat_p[:B, :dims["feat"]]


# ----------------------------------------------------------------------------- public


def fedmaldetect_forward(x, params, *, batch_tile=512, small_batch_threshold=1024,
                         compute_dtype=jnp.float32):
    """Returns (logits, classifier_params, features) like the PyTorch module
    (the nn.Module object itself is replaced by its parameter pytree)."""
    B = x.shape[0]
    if B <= small_batch_threshold:
        logits, feats = _forward_fused(x, params, compute_dtype)
    else:
        logits, feats = _forward_tiled(x, params, batch_tile, compute_dtype)
    classifier_params = {k: params[k] for k in
                         ("w1", "b1", "gamma", "beta", "w3", "b3", "w2", "b2")}
    return logits, classifier_params, feats


def _reference_forward(x, params):
    """Pure-JAX reference of the module's forward (training-mode BN)."""
    f = _leaky_relu(x @ params["w_fe"] + params["b_fe"])
    h = _leaky_relu(f @ params["w1"] + params["b1"])
    mean = jnp.mean(h, axis=0, keepdims=True)
    var = jnp.mean((h - mean) ** 2, axis=0, keepdims=True)
    h = (h - mean) / jnp.sqrt(var + BN_EPS) * params["gamma"] + params["beta"]
    h = _leaky_relu(h @ params["w3"] + params["b3"])
    return h @ params["w2"] + params["b2"], f


if __name__ == "__main__":
    INPUT_DIM, HIDDEN_DIM, OUTPUT_DIM = 16, 32, 2
    key = jax.random.PRNGKey(0)
    k_p, k_xs, k_xl = jax.random.split(key, 3)
    params = init_params(k_p, INPUT_DIM, HIDDEN_DIM, OUTPUT_DIM)

    # --- small-batch path: single fused kernel, no grid machinery ---
    x_small = jax.random.normal(k_xs, (8, INPUT_DIM), jnp.float32)
    logits_s, clf_params, feat_s = fedmaldetect_forward(x_small, params)
    jax.block_until_ready((logits_s, feat_s))
    assert logits_s.shape == (8, OUTPUT_DIM) and feat_s.shape == (8, 32)
    ref_l, ref_f = _reference_forward(x_small, params)
    assert jnp.allclose(logits_s, ref_l, atol=2e-3, rtol=2e-3)
    assert jnp.allclose(feat_s, ref_f, atol=2e-3, rtol=2e-3)

    # --- tiled path: batch streamed over the grid with exact full-batch BatchNorm ---
    x_large = jax.random.normal(k_xl, (200, INPUT_DIM), jnp.float32)
    logits_l, _, feat_l = fedmaldetect_forward(
        x_large, params, batch_tile=128, small_batch_threshold=0)
    jax.block_until_ready((logits_l, feat_l))
    assert logits_l.shape == (200, OUTPUT_DIM) and feat_l.shape == (200, 32)
    ref_l2, ref_f2 = _reference_forward(x_large, params)
    assert jnp.allclose(logits_l, ref_l2, atol=2e-3, rtol=2e-3)
    assert jnp.allclose(feat_l, ref_f2, atol=2e-3, rtol=2e-3)

    print("KERNEL_OK")
</pallas_src>

<mosaic_0001>
module attributes {stable_mosaic.version = 11 : i64} {
  func.func @_fused_kernel(%arg0: memref<8x16xf32, #tpu.memory_space<vmem>>, %arg1: memref<16x128xf32, #tpu.memory_space<vmem>>, %arg2: memref<1x128xf32, #tpu.memory_space<vmem>>, %arg3: memref<128x128xf32, #tpu.memory_space<vmem>>, %arg4: memref<1x128xf32, #tpu.memory_space<vmem>>, %arg5: memref<1x128xf32, #tpu.memory_space<vmem>>, %arg6: memref<1x128xf32, #tpu.memory_space<vmem>>, %arg7: memref<128x128xf32, #tpu.memory_space<vmem>>, %arg8: memref<1x128xf32, #tpu.memory_space<vmem>>, %arg9: memref<128x128xf32, #tpu.memory_space<vmem>>, %arg10: memref<1x128xf32, #tpu.memory_space<vmem>>, %arg11: memref<8x128xf32, #tpu.memory_space<vmem>>, %arg12: memref<8x128xf32, #tpu.memory_space<vmem>>) attributes {dimension_semantics = [], scalar_prefetch = 0 : i64, scratch_operands = 0 : i64, tpu.core_type = #tpu.core_type<tc>} {
    %c0 = arith.constant 0 : index
    %c0_0 = arith.constant 0 : index
    %0 = vector.load %arg0[%c0, %c0_0] : memref<8x16xf32, #tpu.memory_space<vmem>>, vector<8x16xf32>
    %c0_1 = arith.constant 0 : index
    %c0_2 = arith.constant 0 : index
    %1 = vector.load %arg1[%c0_1, %c0_2] : memref<16x128xf32, #tpu.memory_space<vmem>>, vector<16x128xf32>
    %cst = arith.constant dense<0.000000e+00> : vector<8x128xf32>
    %2 = tpu.matmul %0, %1, %cst {dimension_numbers = #tpu.dot_dimension_numbers<[1], [0], [0], [1], [0, 0, 1, 1], [], []>} : vector<8x16xf32>, vector<16x128xf32>, vector<8x128xf32> -> vector<8x128xf32>
    %c0_3 = arith.constant 0 : index
    %c0_4 = arith.constant 0 : index
    %3 = vector.load %arg2[%c0_3, %c0_4] : memref<1x128xf32, #tpu.memory_space<vmem>>, vector<1x128xf32>
    %4 = vector.broadcast %3 : vector<1x128xf32> to vector<8x128xf32>
    %5 = arith.addf %2, %4 : vector<8x128xf32>
    %cst_5 = arith.constant 0.000000e+00 : f32
    %6 = vector.broadcast %cst_5 : f32 to vector<8x128xf32>
    %7 = arith.cmpf oge, %5, %6 : vector<8x128xf32>
    %cst_6 = arith.constant 0.00999999977 : f32
    %8 = vector.broadcast %cst_6 : f32 to vector<8x128xf32>
    %9 = arith.mulf %8, %5 : vector<8x128xf32>
    %10 = arith.select %7, %5, %9 : vector<8x128xi1>, vector<8x128xf32>
    %c0_7 = arith.constant 0 : index
    %c0_8 = arith.constant 0 : index
    %11 = vector.load %arg12[%c0_7, %c0_8] : memref<8x128xf32, #tpu.memory_space<vmem>>, vector<8x128xf32>
    tpu.vector_store %arg12[%c0_7, %c0_8], %10 {strides = array<i32>} : memref<8x128xf32, #tpu.memory_space<vmem>>, vector<8x128xf32>,
    %c0_9 = arith.constant 0 : index
    %c0_10 = arith.constant 0 : index
    %12 = vector.load %arg3[%c0_9, %c0_10] : memref<128x128xf32, #tpu.memory_space<vmem>>, vector<128x128xf32>
    %cst_11 = arith.constant dense<0.000000e+00> : vector<8x128xf32>
    %13 = tpu.matmul %10, %12, %cst_11 {dimension_numbers = #tpu.dot_dimension_numbers<[1], [0], [0], [1], [0, 0, 1, 1], [], []>} : vector<8x128xf32>, vector<128x128xf32>, vector<8x128xf32> -> vector<8x128xf32>
    %c0_12 = arith.constant 0 : index
    %c0_13 = arith.constant 0 : index
    %14 = vector.load %arg4[%c0_12, %c0_13] : memref<1x128xf32, #tpu.memory_space<vmem>>, vector<1x128xf32>
    %15 = vector.broadcast %14 : vector<1x128xf32> to vector<8x128xf32>
    %16 = arith.addf %13, %15 : vector<8x128xf32>
    %cst_14 = arith.constant 0.000000e+00 : f32
    %17 = vector.broadcast %cst_14 : f32 to vector<8x128xf32>
    %18 = arith.cmpf oge, %16, %17 : vector<8x128xf32>
    %cst_15 = arith.constant 0.00999999977 : f32
    %19 = vector.broadcast %cst_15 : f32 to vector<8x128xf32>
    %20 = arith.mulf %19, %16 : vector<8x128xf32>
    %21 = arith.select %18, %16, %20 : vector<8x128xi1>, vector<8x128xf32>
    %cst_16 = arith.constant dense<0.000000e+00> : vector<128xf32>
    %22 = vector.multi_reduction <add>, %21, %cst_16 [0] : vector<8x128xf32> to vector<128xf32>
    %23 = vector.shape_cast %22 : vector<128xf32> to vector<1x128xf32>
    %24 = arith.mulf %21, %21 : vector<8x128xf32>
    %cst_17 = arith.constant dense<0.000000e+00> : vector<128xf32>
    %25 = vector.multi_reduction <add>, %24, %cst_17 [0] : vector<8x128xf32> to vector<128xf32>
    %26 = vector.shape_cast %25 : vector<128xf32> to vector<1x128xf32>
    %cst_18 = arith.constant 1.250000e-01 : f32
    %27 = vector.broadcast %cst_18 : f32 to vector<1x128xf32>
    %28 = arith.mulf %23, %27 : vector<1x128xf32>
    %cst_19 = arith.constant 1.250000e-01 : f32
    %29 = vector.broadcast %cst_19 : f32 to vector<1x128xf32>
    %30 = arith.mulf %26, %29 : vector<1x128xf32>
    %31 = arith.mulf %28, %28 : vector<1x128xf32>
    %32 = arith.subf %30, %31 : vector<1x128xf32>
    %cst_20 = arith.constant 0.000000e+00 : f32
    %33 = vector.broadcast %cst_20 : f32 to vector<1x128xf32>
    %34 = arith.maximumf %32, %33 : vector<1x128xf32>
    %35 = vector.broadcast %28 : vector<1x128xf32> to vector<8x128xf32>
    %36 = arith.subf %21, %35 : vector<8x128xf32>
    %cst_21 = arith.constant 9.99999974E-6 : f32
    %37 = vector.broadcast %cst_21 : f32 to vector<1x128xf32>
    %38 = arith.addf %34, %37 : vector<1x128xf32>
    %39 = math.rsqrt %38 : vector<1x128xf32>
    %40 = vector.broadcast %39 : vector<1x128xf32> to vector<8x128xf32>
    %41 = arith.mulf %36, %40 : vector<8x128xf32>
    %c0_22 = arith.constant 0 : index
    %c0_23 = arith.constant 0 : index
    %42 = vector.load %arg5[%c0_22, %c0_23] : memref<1x128xf32, #tpu.memory_space<vmem>>, vector<1x128xf32>
    %43 = vector.broadcast %42 : vector<1x128xf32> to vector<8x128xf32>
    %44 = arith.mulf %41, %43 : vector<8x128xf32>
    %c0_24 = arith.constant 0 : index
    %c0_25 = arith.constant 0 : index
    %45 = vector.load %arg6[%c0_24, %c0_25] : memref<1x128xf32, #tpu.memory_space<vmem>>, vector<1x128xf32>
    %46 = vector.broadcast %45 : vector<1x128xf32> to vector<8x128xf32>
    %47 = arith.addf %44, %46 : vector<8x128xf32>
    %c0_26 = arith.constant 0 : index
    %c0_27 = arith.constant 0 : index
    %48 = vector.load %arg7[%c0_26, %c0_27] : memref<128x128xf32, #tpu.memory_space<vmem>>, vector<128x128xf32>
    %cst_28 = arith.constant dense<0.000000e+00> : vector<8x128xf32>
    %49 = tpu.matmul %47, %48, %cst_28 {dimension_numbers = #tpu.dot_dimension_numbers<[1], [0], [0], [1], [0, 0, 1, 1], [], []>} : vector<8x128xf32>, vector<128x128xf32>, vector<8x128xf32> -> vector<8x128xf32>
    %c0_29 = arith.constant 0 : index
    %c0_30 = arith.constant 0 : index
    %50 = vector.load %arg8[%c0_29, %c0_30] : memref<1x128xf32, #tpu.memory_space<vmem>>, vector<1x128xf32>
    %51 = vector.broadcast %50 : vector<1x128xf32> to vector<8x128xf32>
    %52 = arith.addf %49, %51 : vector<8x128xf32>
    %cst_31 = arith.constant 0.000000e+00 : f32
    %53 = vector.broadcast %cst_31 : f32 to vector<8x128xf32>
    %54 = arith.cmpf oge, %52, %53 : vector<8x128xf32>
    %cst_32 = arith.constant 0.00999999977 : f32
    %55 = vector.broadcast %cst_32 : f32 to vector<8x128xf32>
    %56 = arith.mulf %55, %52 : vector<8x128xf32>
    %57 = arith.select %54, %52, %56 : vector<8x128xi1>, vector<8x128xf32>
    %c0_33 = arith.constant 0 : index
    %c0_34 = arith.constant 0 : index
    %58 = vector.load %arg9[%c0_33, %c0_34] : memref<128x128xf32, #tpu.memory_space<vmem>>, vector<128x128xf32>
    %cst_35 = arith.constant dense<0.000000e+00> : vector<8x128xf32>
    %59 = tpu.matmul %57, %58, %cst_35 {dimension_numbers = #tpu.dot_dimension_numbers<[1], [0], [0], [1], [0, 0, 1, 1], [], []>} : vector<8x128xf32>, vector<128x128xf32>, vector<8x128xf32> -> vector<8x128xf32>
    %c0_36 = arith.constant 0 : index
    %c0_37 = arith.constant 0 : index
    %60 = vector.load %arg10[%c0_36, %c0_37] : memref<1x128xf32, #tpu.memory_space<vmem>>, vector<1x128xf32>
    %61 = vector.broadcast %60 : vector<1x128xf32> to vector<8x128xf32>
    %62 = arith.addf %59, %61 : vector<8x128xf32>
    %c0_38 = arith.constant 0 : index
    %c0_39 = arith.constant 0 : index
    %63 = vector.load %arg11[%c0_38, %c0_39] : memref<8x128xf32, #tpu.memory_space<vmem>>, vector<8x128xf32>
    tpu.vector_store %arg11[%c0_38, %c0_39], %62 {strides = array<i32>} : memref<8x128xf32, #tpu.memory_space<vmem>>, vector<8x128xf32>,
    return
  }
}

</mosaic_0001>

<bundles_post_ra>
// kernel: tpu_custom_call.1
= control target key start
LH: loop header
LB: loop body
LE: loop exit
PB: predicated region body
PF: predicated region fallthrough
CT: control target
= control target key end

     0   :  { %18 = vsyncpa [#allocation3], 0  ;;  %s1197_s0 = inlined_call_operand.hbm [shape: f32[8,16], index: 0, kind: input, shape index: {}]   ;;  %s1198_s1 = inlined_call_operand.hbm [shape: f32[16,128], index: 1, kind: input, shape index: {}]   ;;  %s1199_s2 = inlined_call_operand.vmem [shape: f32[1,128], index: 2, kind: input, shape index: {}]   ;;  %s1200_s3 = inlined_call_operand.hbm [shape: f32[128,128], index: 3, kind: input, shape index: {}]   ;;  %s1201_s4 = inlined_call_operand.vmem [shape: f32[1,128], index: 4, kind: input, shape index: {}]   ;;  %s1202_s5 = inlined_call_operand.vmem [shape: f32[1,128], index: 5, kind: input, shape index: {}]   ;;  %s1203_s6 = inlined_call_operand.vmem [shape: f32[1,128], index: 6, kind: input, shape index: {}]   ;;  %s1204_s7 = inlined_call_operand.hbm [shape: f32[128,128], index: 7, kind: input, shape index: {}]   ;;  %s1205_s8 = inlined_call_operand.vmem [shape: f32[1,128], index: 8, kind: input, shape index: {}]   ;;  %s1206_s9 = inlined_call_operand.hbm [shape: f32[128,128], index: 9, kind: input, shape index: {}]   ;;  %s1207_s10 = inlined_call_operand.vmem [shape: f32[1,128], index: 10, kind: input, shape index: {}]   ;;  %s1208_s11 = inlined_call_operand.hbm [shape: f32[8,128], index: 11, kind: output, shape index: {0}]   ;;  %s1209_s12 = inlined_call_operand.hbm [shape: f32[8,128], index: 12, kind: output, shape index: {1}]  }
   0x1   :  { %19 = vsyncpa [#allocation6], 0 }
   0x2   :  { %20 = vsyncpa [#allocation9], 0 }
   0x3   :  { %21 = vsyncpa [#allocation4], 0 }
   0x4   :  { %22 = vsyncpa [#allocation13], 0  ;;  %s977_s21 = smov [#allocation5]   ;;  %s813_s25 = scalar_lea.hbm %s1198_s1, 256 }
   0x5   :  { %s38_s22 = sshll.u32 %s977_s21, 4  ;;  %p814_p0 = scmp.ne.s32.totalorder %s1198_s1, %s813_s25  ;;  %s39_s22 = int_to_ptr.vmem [resolvable:$true] %s38_s22 }
   0x6   :  { %p817_p1 = scmp.lt.u32.totalorder %s813_s25, %s1198_s1 }
   0x8   :  { %p819_p2 = pnand %p817_p1, %p814_p0 }
   0xa   :  { %822 = shalt.err (!%p819_p2)
}
   0xb   :  { %s823_s30 = scalar_lea.vmem %s39_s22, 256  ;;  %p828_p4 = scmp.lt.s32.totalorder %s39_s22, %s39_s22 }
   0xc   :  { %p824_p3 = scmp.ne.s32.totalorder %s39_s22, %s823_s30  ;;  %p829_p5 = scmp.lt.s32.totalorder %s823_s30, %s823_s30 }
   0xe   :  { %p830_p6 = por %p829_p5, %p828_p4 }
  0x10   :  { %p831_p7 = pnand %p830_p6, %p824_p3 }
  0x12   :  { %834 = shalt.err (!%p831_p7)
}
  0x13   :  { %s978_s13 = smov 128   ;;  %s979_s14 = smov 8  }
  0x14   :  { %44 = dma.hbm_to_vmem [thread:$0]  %s1198_s1, 256, %s39_s22, [#allocation6], %s978_s13, %s978_s13, %s979_s14  }
  0x15   :  { %s980_s17 = smov [#allocation8]   ;;  %s981_s19 = smov [#allocation2]  }
  0x16   :  { %s70_s18 = sshll.u32 %s980_s17, 4  ;;  %s29_s20 = sshll.u32 %s981_s19, 4  ;;  %s71_s18 = int_to_ptr.vmem [resolvable:$true] %s70_s18  ;;  %s30_s20 = int_to_ptr.vmem [resolvable:$true] %s29_s20 }
  0x17   :  { %s835_s24 = scalar_lea.hbm %s1204_s7, 2048 }
  0x18   :  { %p836_p8 = scmp.ne.s32.totalorder %s1204_s7, %s835_s24  ;;  %p839_p9 = scmp.lt.u32.totalorder %s835_s24, %s1204_s7 }
  0x1a   :  { %p841_p10 = pnand %p839_p9, %p836_p8 }
  0x1c   :  { %844 = shalt.err (!%p841_p10)
}
  0x1d   :  { %s845_s1 = scalar_lea.vmem %s71_s18, 2048  ;;  %p850_p12 = scmp.lt.s32.totalorder %s71_s18, %s71_s18 }
  0x1e   :  { %p846_p11 = scmp.ne.s32.totalorder %s71_s18, %s845_s1  ;;  %p851_p13 = scmp.lt.s32.totalorder %s845_s1, %s845_s1 }
  0x20   :  { %p852_p0 = por %p851_p13, %p850_p12 }
  0x22   :  { %p853_p1 = pnand %p852_p0, %p846_p11 }
  0x24   :  { %856 = shalt.err (!%p853_p1)
}
  0x25   :  { %76 = dma.hbm_to_vmem [thread:$0]  %s1204_s7, 2048, %s71_s18, [#allocation9], %s978_s13, %s978_s13, %s979_s14  }
  0x26   :  { %s857_s16 = scalar_lea.hbm %s1197_s0, 128 }
  0x27   :  { %p858_p2 = scmp.ne.s32.totalorder %s1197_s0, %s857_s16  ;;  %p861_p3 = scmp.lt.u32.totalorder %s857_s16, %s1197_s0 }
  0x29   :  { %p863_p4 = pnand %p861_p3, %p858_p2 }
  0x2b   :  { %866 = shalt.err (!%p863_p4)
}
  0x2c   :  { %s867_s24 = scalar_lea.vmem %s30_s20, 128  ;;  %p872_p6 = scmp.lt.s32.totalorder %s30_s20, %s30_s20 }
  0x2d   :  { %p868_p5 = scmp.ne.s32.totalorder %s30_s20, %s867_s24  ;;  %p873_p7 = scmp.lt.s32.totalorder %s867_s24, %s867_s24 }
  0x2f   :  { %p874_p8 = por %p873_p7, %p872_p6 }
  0x31   :  { %p875_p9 = pnand %p874_p8, %p868_p5 }
  0x33   :  { %878 = shalt.err (!%p875_p9)
}
  0x34   :  { %32 = dma.hbm_to_vmem [thread:$0]  %s1197_s0, 128, %s30_s20, [#allocation3]  }
  0x35   :  { %s982_s25 = smov [#allocation7]   ;;  %s983_s27 = smov [#allocation10]  }
  0x36   :  { %s52_s26 = sshll.u32 %s982_s25, 4  ;;  %s84_s28 = sshll.u32 %s983_s27, 4  ;;  %s53_s26 = int_to_ptr.vmem [resolvable:$true] %s52_s26  ;;  %s85_s28 = int_to_ptr.vmem [resolvable:$true] %s84_s28 }
  0x37   :  { %s879_s29 = scalar_lea.hbm %s1200_s3, 2048 }
  0x38   :  { %p880_p10 = scmp.ne.s32.totalorder %s1200_s3, %s879_s29  ;;  %p883_p11 = scmp.lt.u32.totalorder %s879_s29, %s1200_s3 }
  0x3a   :  { %p885_p12 = pnand %p883_p11, %p880_p10 }
  0x3c   :  { %888 = shalt.err (!%p885_p12)
}
  0x3d   :  { %s889_s0 = scalar_lea.vmem %s53_s26, 2048  ;;  %p894_p0 = scmp.lt.s32.totalorder %s53_s26, %s53_s26 }
  0x3e   :  { %p890_p13 = scmp.ne.s32.totalorder %s53_s26, %s889_s0  ;;  %p895_p1 = scmp.lt.s32.totalorder %s889_s0, %s889_s0 }
  0x40   :  { %p896_p2 = por %p895_p1, %p894_p0 }
  0x42   :  { %p897_p3 = pnand %p896_p2, %p890_p13 }
  0x44   :  { %900 = shalt.err (!%p897_p3)
}
  0x45   :  { %58 = dma.hbm_to_vmem [thread:$0]  %s1200_s3, 2048, %s53_s26, [#allocation6], %s978_s13, %s978_s13, %s979_s14  }
  0x46   :  { %s901_s24 = scalar_lea.hbm %s1206_s9, 2048 }
  0x47   :  { %p902_p4 = scmp.ne.s32.totalorder %s1206_s9, %s901_s24  ;;  %p905_p5 = scmp.lt.u32.totalorder %s901_s24, %s1206_s9 }
  0x49   :  { %p907_p6 = pnand %p905_p5, %p902_p4 }
  0x4b   :  { %910 = shalt.err (!%p907_p6)
}
  0x4c   :  { %s911_s1 = scalar_lea.vmem %s85_s28, 2048  ;;  %p916_p8 = scmp.lt.s32.totalorder %s85_s28, %s85_s28 }
  0x4d   :  { %p912_p7 = scmp.ne.s32.totalorder %s85_s28, %s911_s1  ;;  %p917_p9 = scmp.lt.s32.totalorder %s911_s1, %s911_s1 }
  0x4f   :  { %p918_p10 = por %p917_p9, %p916_p8 }
  0x51   :  { %p919_p11 = pnand %p918_p10, %p912_p7 }
  0x53   :  { %922 = shalt.err (!%p919_p11)
}
  0x54   :  { %90 = dma.hbm_to_vmem [thread:$0]  %s1206_s9, 2048, %s85_s28, [#allocation9], %s978_s13, %s978_s13, %s979_s14  }
  0x55   :  { %967 = dma.done.wait [#allocation3], 128  }
  0x56   :  { %968 = vsyncadd [#allocation3], 4294967168 }
  0x57   :  { %969 = dma.done.wait [#allocation6], 2304  }
  0x58   :  { %970 = vsyncadd [#allocation6], 4294964992 }
  0x59   :  { %971 = dma.done.wait [#allocation9], 4096  }
  0x5a   :  { %972 = vsyncadd [#allocation9], 4294963200  ;;  %v984_v0 = vmov 0.0|0.0   ;;  %vm985_vm0 = vmmov 0   ;;  %v986_v1 = vmov 0.0   ;;  %v109_v2 = vld [vmem:[#allocation5] sm:$0xff] }
  0x5b   :  { %724 = vmatprep.subr.bf16.mxu0 %v984_v0  ;;  %616 = vmatprep.mubr.msk.f32.mxu0 %vm985_vm0, %v986_v1  ;;  %v110_v3 = vld [vmem:[#allocation5 + $0x8] sm:$0xff]  ;;  %v196_v5 = vld [vmem:[#allocation7] sm:$0xff]  ;;  %v197_v6 = vld [vmem:[#allocation7 + $0x8] sm:$0xff]  ;;  %vm118_vm1 = vcmask 130048  }
  0x5c   :  { %727 = vmatprep.subr.bf16.mxu1 %v984_v0  ;;  %651 = vmatprep.mubr.msk.f32.mxu1 %vm985_vm0, %v986_v1  ;;  %v725_v4 = vpack.c.bf16 %v110_v3, %v109_v2  ;;  %v198_v7 = vld [vmem:[#allocation7 + $0x10] sm:$0xff]  ;;  %v728_v8 = vpack.c.bf16 %v197_v6, %v196_v5  ;;  %v199_v9 = vld [vmem:[#allocation7 + $0x18] sm:$0xff]  ;;  %v108_v10 = vld [vmem:[#allocation2] sm:$0xff] }
  0x5d   :  { %v731_v11 = vpack.c.bf16 %v199_v9, %v198_v7  ;;  %v200_v12 = vld [vmem:[#allocation7 + $0x20] sm:$0xff]  ;;  %v201_v13 = vld [vmem:[#allocation7 + $0x28] sm:$0xff]  ;;  %v202_v15 = vld [vmem:[#allocation7 + $0x30] sm:$0xff] }
  0x5e   :  { %726 = vmatpush3.bf16.msra.mxu0 %v725_v4  ;;  %729 = vmatpush3.bf16.msra.mxu1 %v728_v8  ;;  %v734_v14 = vpack.c.bf16 %v201_v13, %v200_v12  ;;  %v203_v16 = vld [vmem:[#allocation7 + $0x38] sm:$0xff]  ;;  %v204_v18 = vld [vmem:[#allocation7 + $0x40] sm:$0xff]  ;;  %v205_v19 = vld [vmem:[#allocation7 + $0x48] sm:$0xff] }
  0x5f   :  { %751 = vmatprep.subr.bf16.mxu0 %v984_v0  ;;  %730 = vmatprep.subr.bf16.mxu1 %v984_v0  ;;  %v737_v17 = vpack.c.bf16 %v203_v16, %v202_v15  ;;  %v740_v20 = vpack.c.bf16 %v205_v19, %v204_v18  ;;  %v206_v21 = vld [vmem:[#allocation7 + $0x50] sm:$0xff]  ;;  %v207_v22 = vld [vmem:[#allocation7 + $0x58] sm:$0xff]  ;;  %v208_v24 = vld [vmem:[#allocation7 + $0x60] sm:$0xff] }
  0x60   :  { %v743_v23 = vpack.c.bf16 %v207_v22, %v206_v21  ;;  %v209_v25 = vld [vmem:[#allocation7 + $0x68] sm:$0xff]  ;;  %v210_v27 = vld [vmem:[#allocation7 + $0x70] sm:$0xff]  ;;  %v211_v28 = vld [vmem:[#allocation7 + $0x78] sm:$0xff] }
  0x61   :  { %617 = vmatmul.mubr.msk.f32.vlgmr.msra.gmra.mrb[0].mxu0 %vm118_vm1, %v108_v10  ;;  %v746_v26 = vpack.c.bf16 %v209_v25, %v208_v24  ;;  %v749_v29 = vpack.c.bf16 %v211_v28, %v210_v27  ;;  %v551_v30 = vld [vmem:[%s1199_s2] ss:$0 sm:$0xff]  ;;  %v330_v36 = vld [vmem:[#allocation8] sm:$0xff]  ;;  %v332_v39 = vld [vmem:[#allocation8 + $0x10] sm:$0xff] }
  0x62   :  { %686 = vmatprep.mubr.msk.f32.mxu0 %vm985_vm0, %v986_v1  ;;  %732 = vmatpush3.bf16.msra.mxu1 %v731_v11  ;;  %v331_v37 = vld [vmem:[#allocation8 + $0x8] sm:$0xff]  ;;  %v333_v40 = vld [vmem:[#allocation8 + $0x18] sm:$0xff]  ;;  %v334_v42 = vld [vmem:[#allocation8 + $0x20] sm:$0xff] }
  0x63   :  { %733 = vmatprep.subr.bf16.mxu1 %v984_v0  ;;  %v752_v38 = vpack.c.bf16 %v331_v37, %v330_v36  ;;  %v755_v41 = vpack.c.bf16 %v333_v40, %v332_v39  ;;  %v335_v43 = vld [vmem:[#allocation8 + $0x28] sm:$0xff]  ;;  %v336_v45 = vld [vmem:[#allocation8 + $0x30] sm:$0xff]  ;;  %v337_v46 = vld [vmem:[#allocation8 + $0x38] sm:$0xff] }
  0x64   :  { %v758_v44 = vpack.c.bf16 %v335_v43, %v334_v42  ;;  %v761_v47 = vpack.c.bf16 %v337_v46, %v336_v45  ;;  %v338_v48 = vld [vmem:[#allocation8 + $0x40] sm:$0xff]  ;;  %v339_v49 = vld [vmem:[#allocation8 + $0x48] sm:$0xff]  ;;  %v340_v51 = vld [vmem:[#allocation8 + $0x50] sm:$0xff] }
  0x65   :  { %753 = vmatpush3.bf16.msra.mxu0 %v752_v38  ;;  %v764_v50 = vpack.c.bf16 %v339_v49, %v338_v48  ;;  %v341_v52 = vld [vmem:[#allocation8 + $0x58] sm:$0xff]  ;;  %v342_v54 = vld [vmem:[#allocation8 + $0x60] sm:$0xff]  ;;  %v343_v55 = vld [vmem:[#allocation8 + $0x68] sm:$0xff] }
  0x66   :  { %735 = vmatpush3.bf16.msra.mxu1 %v734_v14  ;;  %754 = vmatprep.subr.bf16.mxu0 %v984_v0  ;;  %v767_v53 = vpack.c.bf16 %v341_v52, %v340_v51  ;;  %v770_v56 = vpack.c.bf16 %v343_v55, %v342_v54  ;;  %v344_v57 = vld [vmem:[#allocation8 + $0x70] sm:$0xff]  ;;  %v345_v58 = vld [vmem:[#allocation8 + $0x78] sm:$0xff]  ;;  %v426_v60 = vld [vmem:[#allocation10] sm:$0xff] }
  0x67   :  { %736 = vmatprep.subr.bf16.mxu1 %v984_v0  ;;  %v773_v59 = vpack.c.bf16 %v345_v58, %v344_v57  ;;  %v427_v61 = vld [vmem:[#allocation10 + $0x8] sm:$0xff]  ;;  %v428_v62 = vld [vmem:[#allocation10 + $0x10] sm:$0xff]  ;;  %v430_v3 = vld [vmem:[#allocation10 + $0x20] sm:$0xff] }
  0x68   :  { %v776_v63 = vpack.c.bf16 %v427_v61, %v426_v60  ;;  %v431_v4 = vld [vmem:[#allocation10 + $0x28] sm:$0xff]  ;;  %v432_v6 = vld [vmem:[#allocation10 + $0x30] sm:$0xff]  ;;  %v433_v7 = vld [vmem:[#allocation10 + $0x38] sm:$0xff] }
  0x69   :  { %756 = vmatpush3.bf16.msra.mxu0 %v755_v41  ;;  %v782_v5 = vpack.c.bf16 %v431_v4, %v430_v3  ;;  %v785_v8 = vpack.c.bf16 %v433_v7, %v432_v6  ;;  %v434_v9 = vld [vmem:[#allocation10 + $0x40] sm:$0xff]  ;;  %v435_v10 = vld [vmem:[#allocation10 + $0x48] sm:$0xff]  ;;  %v436_v12 = vld [vmem:[#allocation10 + $0x50] sm:$0xff] }
  0x6a   :  { %738 = vmatpush3.bf16.msra.mxu1 %v737_v17  ;;  %757 = vmatprep.subr.bf16.mxu0 %v984_v0  ;;  %v788_v11 = vpack.c.bf16 %v435_v10, %v434_v9  ;;  %v437_v13 = vld [vmem:[#allocation10 + $0x58] sm:$0xff]  ;;  %v438_v15 = vld [vmem:[#allocation10 + $0x60] sm:$0xff]  ;;  %v439_v16 = vld [vmem:[#allocation10 + $0x68] sm:$0xff] }
  0x6b   :  { %739 = vmatprep.subr.bf16.mxu1 %v984_v0  ;;  %v791_v14 = vpack.c.bf16 %v437_v13, %v436_v12  ;;  %v794_v17 = vpack.c.bf16 %v439_v16, %v438_v15  ;;  %v553_v18 = vld [vmem:[%s1201_s4] ss:$0 sm:$0xff]  ;;  %v440_v49 = vld [vmem:[#allocation10 + $0x70] sm:$0xff] }
  0x6c   :  { %v555_v46 = vld [vmem:[%s1203_s6] ss:$0 sm:$0xff] }
  0x6d   :  { %759 = vmatpush3.bf16.msra.mxu0 %v758_v44  ;;  %v554_v44 = vld [vmem:[%s1202_s5] ss:$0 sm:$0xff]  ;;  %s987_s5 = smov [#allocation12]  }
  0x6e   :  { %741 = vmatpush3.bf16.msra.mxu1 %v740_v20  ;;  %760 = vmatprep.subr.bf16.mxu0 %v984_v0  ;;  %v556_v52 = vld [vmem:[%s1205_s8] ss:$0 sm:$0xff]  ;;  %s536_s6 = sshll.u32 %s987_s5, 4  ;;  %s537_s6 = int_to_ptr.vmem [resolvable:$true] %s536_s6 }
  0x6f   :  { %742 = vmatprep.subr.bf16.mxu1 %v984_v0  ;;  %s923_s16 = scalar_lea.vmem %s537_s6, 128  ;;  %p928_p13 = scmp.lt.s32.totalorder %s537_s6, %s537_s6 }
  0x70   :  { %p924_p12 = scmp.ne.s32.totalorder %s537_s6, %s923_s16  ;;  %p929_p0 = scmp.lt.s32.totalorder %s923_s16, %s923_s16 }
  0x71   :  { %762 = vmatpush3.bf16.msra.mxu0 %v761_v47 }
  0x72   :  { %744 = vmatpush3.bf16.msra.mxu1 %v743_v23  ;;  %763 = vmatprep.subr.bf16.mxu0 %v984_v0  ;;  %p930_p1 = por %p929_p0, %p928_p13 }
  0x73   :  { %745 = vmatprep.subr.bf16.mxu1 %v984_v0 }
  0x74   :  { %p931_p2 = pnand %p930_p1, %p924_p12 }
  0x75   :  { %765 = vmatpush3.bf16.msra.mxu0 %v764_v50  ;;  %v441_v50 = vld [vmem:[#allocation10 + $0x78] sm:$0xff] }
  0x76   :  { %747 = vmatpush3.bf16.msra.mxu1 %v746_v26  ;;  %766 = vmatprep.subr.bf16.mxu0 %v984_v0  ;;  %v797_v51 = vpack.c.bf16 %v441_v50, %v440_v49 }
  0x77   :  { %748 = vmatprep.subr.bf16.mxu1 %v984_v0 }
  0x79   :  { %768 = vmatpush3.bf16.msra.mxu0 %v767_v53 }
  0x7a   :  { %750 = vmatpush3.bf16.msra.mxu1 %v749_v29  ;;  %769 = vmatprep.subr.bf16.mxu0 %v984_v0 }
  0x7b   :  { %775 = vmatprep.subr.bf16.mxu1 %v984_v0 }
  0x7d   :  { %771 = vmatpush3.bf16.msra.mxu0 %v770_v56 }
  0x7e   :  { %772 = vmatprep.subr.bf16.mxu0 %v984_v0 }
  0x81   :  { %774 = vmatpush3.bf16.msra.mxu0 %v773_v59 }
 0x134   :  { %v188_v31 = vpop.f32.mrb[0].mxu0 }
 0x135   :  { %v189_v32 = vadd.f32 %v551_v30, %v188_v31  ;;  %v618_v33 = vpop.f32.mrb[1].mxu0 }
 0x137   :  { %v193_v34 = vmul.f32 0.01, %v189_v32  ;;  %vm192_vm2 = vcmp.ge.f32.partialorder %v189_v32, 0.0 }
 0x139   :  { %v194_v35 = vsel %vm192_vm2, %v189_v32, %v193_v34 }
 0x13a   :  { %652 = vmatmul.mubr.f32.vlgmr.msra.gmra.mrb[0].mxu1 %v194_v35  ;;  %195 = vst [vmem:[#allocation12] sm:$0xff] %v194_v35 }
 0x13b   :  { %721 = vmatprep.mubr.msk.f32.mxu1 %vm985_vm0, %v986_v1  ;;  %v429_v1 = vld [vmem:[#allocation10 + $0x18] sm:$0xff]  ;;  %777 = vmatpush3.bf16.msra.mxu1 %v776_v63 }
 0x13c   :  { %v779_v2 = vpack.c.bf16 %v429_v1, %v428_v62  ;;  %778 = vmatprep.subr.bf16.mxu1 %v984_v0 }
 0x13f   :  { %780 = vmatpush3.bf16.msra.mxu1 %v779_v2 }
 0x140   :  { %781 = vmatprep.subr.bf16.mxu1 %v984_v0 }
 0x143   :  { %783 = vmatpush3.bf16.msra.mxu1 %v782_v5 }
 0x144   :  { %784 = vmatprep.subr.bf16.mxu1 %v984_v0 }
 0x147   :  { %786 = vmatpush3.bf16.msra.mxu1 %v785_v8 }
 0x148   :  { %787 = vmatprep.subr.bf16.mxu1 %v984_v0 }
 0x14b   :  { %789 = vmatpush3.bf16.msra.mxu1 %v788_v11 }
 0x14c   :  { %790 = vmatprep.subr.bf16.mxu1 %v984_v0 }
 0x14f   :  { %792 = vmatpush3.bf16.msra.mxu1 %v791_v14 }
 0x150   :  { %793 = vmatprep.subr.bf16.mxu1 %v984_v0 }
 0x153   :  { %795 = vmatpush3.bf16.msra.mxu1 %v794_v17 }
 0x154   :  { %796 = vmatprep.subr.bf16.mxu1 %v984_v0 }
 0x157   :  { %798 = vmatpush3.bf16.msra.mxu1 %v797_v51 }
 0x20d   :  { %v285_v19 = vpop.f32.mrb[0].mxu1 }
 0x20e   :  { %v286_v20 = vadd.f32 %v553_v18, %v285_v19  ;;  %v653_v21 = vpop.f32.mrb[1].mxu1 }
 0x210   :  { %vm289_vm3 = vcmp.ge.f32.partialorder %v286_v20, 0.0  ;;  %v290_v22 = vmul.f32 0.01, %v286_v20 }
 0x212   :  { %v291_v23 = vsel %vm289_vm3, %v286_v20, %v290_v22 }
 0x213   :  { %v292_v24 = vrot.slane %v291_v23, 4  ;;  %v298_v25 = vmul.f32 %v291_v23, %v291_v23 }
 0x215   :  { %v293_v26 = vadd.f32 %v292_v24, %v291_v23  ;;  %v299_v27 = vrot.slane %v298_v25, 4 }
 0x217   :  { %v294_v28 = vrot.slane %v293_v26, 2  ;;  %v300_v29 = vadd.f32 %v299_v27, %v298_v25 }
 0x219   :  { %v295_v30 = vadd.f32 %v294_v28, %v293_v26  ;;  %v301_v31 = vrot.slane %v300_v29, 2 }
 0x21b   :  { %v296_v32 = vrot.slane %v295_v30, 1  ;;  %v302_v0 = vadd.f32 %v301_v31, %v300_v29 }
 0x21d   :  { %v297_v33 = vadd.f32 %v296_v32, %v295_v30  ;;  %v303_v34 = vrot.slane %v302_v0, 1 }
 0x21f   :  { %v304_v35 = vadd.f32 %v303_v34, %v302_v0  ;;  %v305_v36 = vmul.f32 0.125, %v297_v33 }
 0x221   :  { %v306_v37 = vmul.f32 0.125, %v304_v35  ;;  %v307_v38 = vmul.f32 %v305_v36, %v305_v36  ;;  %v310_v42 = vsub.f32 %v291_v23, %v305_v36 }
 0x223   :  { %v308_v39 = vsub.f32 %v306_v37, %v307_v38 }
 0x225   :  { %v309_v40 = vmax.f32 %v308_v39, 0.0 }
 0x227   :  { %v311_v41 = vadd.f32 1e-05, %v309_v40 }
 0x229   :  { %811 = vrsqrt.f32 %v311_v41 }
 0x233   :  { %v812_v43 = vpop.eup %811 }
 0x234   :  { %v313_v45 = vmul.f32 %v812_v43, %v310_v42 }
 0x236   :  { %v321_v47 = vmul.f32 %v554_v44, %v313_v45 }
 0x238   :  { %v329_v48 = vadd.f32 %v555_v46, %v321_v47 }
 0x23a   :  { %687 = vmatmul.mubr.f32.vlgmr.msra.gmra.mrb[2].mxu0 %v329_v48 }
 0x30d   :  { %v419_v53 = vpop.f32.mrb[2].mxu0 }
 0x30e   :  { %v420_v54 = vadd.f32 %v556_v52, %v419_v53  ;;  %v688_v55 = vpop.f32.mrb[3].mxu0 }
 0x310   :  { %vm423_vm4 = vcmp.ge.f32.partialorder %v420_v54, 0.0  ;;  %v424_v56 = vmul.f32 0.01, %v420_v54 }
 0x312   :  { %v425_v57 = vsel %vm423_vm4, %v420_v54, %v424_v56 }
 0x313   :  { %722 = vmatmul.mubr.f32.vlgmr.msra.gmra.mrb[2].mxu1 %v425_v57 }
 0x314   :  { %934 = shalt.err (!%p931_p2)
}
 0x315   :  { %s935_s8 = scalar_lea.hbm %s1209_s12, 128 }
 0x316   :  { %p936_p3 = scmp.ne.s32.totalorder %s1209_s12, %s935_s8  ;;  %p939_p4 = scmp.lt.u32.totalorder %s935_s8, %s1209_s12 }
 0x318   :  { %p941_p5 = pnand %p939_p4, %p936_p3 }
 0x31a   :  { %944 = shalt.err (!%p941_p5)
}
 0x31b   :  { %539 = dma.vmem_to_hbm [thread:$0]  %s537_s6, 128, %s1209_s12, [#allocation13]   ;;  %v557_v58 = vld [vmem:[%s1207_s10] ss:$0 sm:$0xff] }
 0x31c   :  { %s988_s27 = smov [#allocation11]  }
 0x31d   :  { %s526_s1 = sshll.u32 %s988_s27, 4  ;;  %s527_s1 = int_to_ptr.vmem [resolvable:$true] %s526_s1 }
 0x31e   :  { %s945_s3 = scalar_lea.vmem %s527_s1, 128  ;;  %p950_p7 = scmp.lt.s32.totalorder %s527_s1, %s527_s1 }
 0x31f   :  { %p946_p6 = scmp.ne.s32.totalorder %s527_s1, %s945_s3  ;;  %p951_p8 = scmp.lt.s32.totalorder %s945_s3, %s945_s3 }
 0x321   :  { %p952_p9 = por %p951_p8, %p950_p7 }
 0x323   :  { %p953_p10 = pnand %p952_p9, %p946_p6 }
 0x3e6   :  { %v515_v59 = vpop.f32.mrb[2].mxu1 }
 0x3e7   :  { %v516_v60 = vadd.f32 %v557_v58, %v515_v59  ;;  %v723_v61 = vpop.f32.mrb[3].mxu1 }
 0x3e9   :  { %519 = vst [vmem:[#allocation11] sm:$0xff] %v516_v60 }
 0x3ea   :  { %956 = shalt.err (!%p953_p10)
}
 0x3eb   :  { %s957_s9 = scalar_lea.hbm %s1208_s11, 128 }
 0x3ec   :  { %p958_p11 = scmp.ne.s32.totalorder %s1208_s11, %s957_s9  ;;  %p961_p12 = scmp.lt.u32.totalorder %s957_s9, %s1208_s11 }
 0x3ee   :  { %p963_p13 = pnand %p961_p12, %p958_p11 }
 0x3f0   :  { %966 = shalt.err (!%p963_p13)
}
 0x3f1   :  { %529 = dma.vmem_to_hbm [thread:$0]  %s527_s1, 128, %s1208_s11, [#allocation4]  }
 0x3f2   :  { %973 = dma.done.wait [#allocation4], 128  }
 0x3f3   :  { %974 = vsyncadd [#allocation4], 4294967168 }
 0x3f4   :  { %975 = dma.done.wait [#allocation13], 128  }
 0x3f5   :  { %976 = vsyncadd [#allocation13], 4294967168 }
 0x3f6   :  { %546 = vsyncpa [#allocation3], 1 }
 0x3f7   :  { %547 = vsyncpa [#allocation6], 1 }
 0x3f8   :  { %548 = vsyncpa [#allocation9], 1 }
 0x3f9   :  { %549 = vsyncpa [#allocation4], 1 }
 0x3fa   :  { %550 = vsyncpa [#allocation13], 1 }

</bundles_post_ra>
